<compile_context>
chip_gen: v5e
topology: v5e:2x2
jax: 0.10.0
libtpu: 0.0.40
codegen_flags: <defaults>
</compile_context>

<pallas_src>
import functools

import jax
import jax.numpy as jnp
from jax import lax
from jax.experimental import pallas as pl
from jax.experimental.pallas import tpu as pltpu


def _semantic_grouping_kernel(x_ref, s_ref, dots_ref, acc_xa_ref, acc_a_ref,
                              *, temp, eps):
    """One (batch, split, n-tile) grid step.

    x_ref:      (D, TN)  feature tile (f32 or bf16; cast to f32 in-kernel)
    s_ref:      (K, D)   pre-L2-normalized slot table (resident, fetched once)
    dots_ref:   (K, TN)  raw cosine similarities (lane-dense output)
    acc_xa_ref: (D, K)   partial sum_n x[d,n] * attn[k,n]  (output, resident)
    acc_a_ref:  (K, 1)   partial sum_n attn[k,n]           (output, resident)
    """
    nt = pl.program_id(2)

    @pl.when(nt == 0)
    def _init():
        acc_xa_ref[...] = jnp.zeros_like(acc_xa_ref)
        acc_a_ref[...] = jnp.zeros_like(acc_a_ref)

    x = x_ref[...].astype(jnp.float32)          # (D, TN)
    s = s_ref[...].astype(jnp.float32)          # (K, D)  already L2-normalized

    # Inverse L2 norm of x along D, per spatial position -> (1, TN).
    # rsqrt(max(ss, 1e-24)) == 1 / max(||x||, 1e-12)  (matches F.normalize).
    ss = jnp.sum(x * x, axis=0, keepdims=True)
    inv_norm = lax.rsqrt(jnp.maximum(ss, 1e-24))

    # dots[k, n] = <s_norm[k], x_norm[:, n]>; x's norm folded in *after* the
    # MXU matmul so x_norm is never materialized. Natural (K,D)x(D,TN) form.
    raw = lax.dot_general(s, x, (((1,), (0,)), ((), ())),
                          preferred_element_type=jnp.float32)     # (K, TN)
    dots = raw * inv_norm
    dots_ref[...] = dots

    # Softmax over K (axis 0), then + eps. Exact divide: DMA-bound kernel,
    # the VALU divide is free filler (perf review).
    logits = dots * (1.0 / temp)
    m = jnp.max(logits, axis=0, keepdims=True)
    p = jnp.exp(logits - m)
    attn = p / jnp.sum(p, axis=0, keepdims=True) + eps            # (K, TN)

    # Partial accumulators across N tiles (combined + normalized in wrapper):
    #   acc_xa[d, k] += sum_n x[d, n] * attn[k, n]
    #   acc_a [k]    += sum_n attn[k, n]
    # A @ B^T form (contract the lane axis of both operands, flash-attn
    # style): the big (D, TN) x tile is the untransposed MXU LHS, so only the
    # tiny 8-row attn matrix can pick up a relayout -- avoids a potential
    # D x TN per-step vxpose that could bind the XLU at large TN on v7x.
    acc_xa_ref[...] += lax.dot_general(x, attn, (((1,), (1,)), ((), ())),
                                       preferred_element_type=jnp.float32)
    acc_a_ref[...] += jnp.sum(attn, axis=1, keepdims=True)


def _vmem_capacity_bytes():
    try:
        cap = getattr(pltpu.get_tpu_info(), "vmem_capacity_bytes", None)
        if cap:
            return int(cap)
    except Exception:
        pass
    return 64 << 20          # conservative fallback: v7x physical per-core VMEM


def _per_step_vmem_bytes(tile_n, D, K, x_itemsize):
    # Rough upper bound of the per-step working set:
    #   double-buffered x tile + double-buffered dots tile
    #   + in-kernel f32 temps (x cast, x*x, logits/p/attn)
    #   + resident accumulators + slot table + slack.
    return (2 * D * tile_n * x_itemsize
            + 2 * K * tile_n * 4
            + 2 * D * tile_n * 4
            + 4 * K * tile_n * 4
            + (D * K + K + K * D) * 4
            + (1 << 20))


def _pick_tile_n(N, D, K, x_itemsize, budget_bytes):
    """Largest multiple of 128 that divides N and fits the VMEM budget."""
    candidates = [t for t in range(128, N + 1, 128) if N % t == 0]
    fitting = [t for t in candidates
               if _per_step_vmem_bytes(t, D, K, x_itemsize) <= budget_bytes]
    if fitting:
        return max(fitting)
    if candidates:
        return min(candidates)
    return N   # N not a multiple of 128: single full-extent block (legal).


def semantic_grouping(x_nchw, slot_embed, *, temp=0.07, eps=1e-6,
                      tile_n=None, n_splits=None):
    """slotcon SemanticGrouping forward.

    x_nchw:     (B, D, H, W) features (float32 or bfloat16).
    slot_embed: (K, D) slot embedding table.
    Returns (slots_out (B, K, D) f32, dots (B, K, H, W) f32).
    """
    B, D, H, W = x_nchw.shape
    K = slot_embed.shape[0]
    N = H * W
    x_itemsize = jnp.dtype(x_nchw.dtype).itemsize

    # (B, D, H, W) -> (B, D, N): pure reshape, no transpose / HBM round trip.
    x_bdn = x_nchw.reshape(B, D, N)

    # Slot L2-normalization hoisted out of the grid loop (tiny (K, D) op),
    # exactly matching F.normalize(slots, dim=2).
    s_norm = slot_embed / jnp.maximum(
        jnp.linalg.norm(slot_embed, axis=-1, keepdims=True), 1e-12)
    s_norm = s_norm.astype(jnp.float32)

    vmem_cap = _vmem_capacity_bytes()
    if tile_n is None:
        tile_n = _pick_tile_n(N, D, K, x_itemsize, vmem_cap // 2)
    assert N % tile_n == 0, "tile_n must divide H*W"
    n_tiles = N // tile_n

    # v7x has two TensorCores; when B == 1 the batch axis alone can't feed
    # both, so split the N reduction into parallel chunks whose partial sums
    # are combined in the wrapper. No-op for B >= 2 (and for single-TC chips).
    if n_splits is None:
        n_splits = 2 if (B == 1 and n_tiles % 2 == 0) else 1
    assert n_tiles % n_splits == 0, "n_splits must divide the number of N tiles"
    tiles_per_split = n_tiles // n_splits

    est_need = _per_step_vmem_bytes(tile_n, D, K, x_itemsize)
    vmem_limit = int(min(max(2 * est_need, 32 << 20),
                         max(vmem_cap - (4 << 20), est_need + (4 << 20))))

    kernel = functools.partial(_semantic_grouping_kernel, temp=temp, eps=eps)

    cost = pl.CostEstimate(
        flops=4 * B * K * D * N,                       # two K x D x N matmuls
        transcendentals=B * N * (K + 1),               # exp over K + rsqrt
        bytes_accessed=(B * D * N * x_itemsize
                        + 4 * (B * K * N
                               + B * n_splits * (D * K + K)
                               + K * D)),
    )

    dots_bkn, acc_xa, acc_a = pl.pallas_call(
        kernel,
        out_shape=(
            jax.ShapeDtypeStruct((B, K, N), jnp.float32),
            jax.ShapeDtypeStruct((B, n_splits, D, K), jnp.float32),
            jax.ShapeDtypeStruct((B, n_splits, K, 1), jnp.float32),
        ),
        grid_spec=pltpu.PrefetchScalarGridSpec(
            num_scalar_prefetch=0,
            grid=(B, n_splits, tiles_per_split),       # N reduction is last
            in_specs=[
                pl.BlockSpec((pl.Squeezed(), D, tile_n),
                             lambda b, s, n: (b, 0, s * tiles_per_split + n)),
                pl.BlockSpec((K, D), lambda b, s, n: (0, 0)),
            ],
            out_specs=[
                pl.BlockSpec((pl.Squeezed(), K, tile_n),
                             lambda b, s, n: (b, 0, s * tiles_per_split + n)),
                pl.BlockSpec((pl.Squeezed(), pl.Squeezed(), D, K),
                             lambda b, s, n: (b, s, 0, 0)),      # resident acc
                pl.BlockSpec((pl.Squeezed(), pl.Squeezed(), K, 1),
                             lambda b, s, n: (b, s, 0, 0)),      # resident acc
            ],
        ),
        compiler_params=pltpu.CompilerParams(
            dimension_semantics=("parallel", "parallel", "arbitrary"),
            vmem_limit_bytes=vmem_limit),
        cost_estimate=cost,
    )(x_bdn, s_norm)

    # Tiny cross-split combine + exact per-slot spatial normalization
    # (B*K*D elements: negligible next to the kernel's HBM traffic).
    sum_xa = jnp.swapaxes(jnp.sum(acc_xa, axis=1), 1, 2)        # (B, K, D)
    sum_a = jnp.sum(acc_a, axis=1)                              # (B, K, 1)
    slots_out = sum_xa / sum_a

    # (B, K, N) -> (B, K, H, W): pure reshape, matches PyTorch output layout.
    dots = dots_bkn.reshape(B, K, H, W)
    return slots_out, dots


def _reference(x_nchw, slot_embed, temp=0.07, eps=1e-6):
    B, D, H, W = x_nchw.shape
    K = slot_embed.shape[0]
    slots = jnp.broadcast_to(slot_embed[None], (B, K, D))
    sn = slots / jnp.maximum(
        jnp.linalg.norm(slots, axis=2, keepdims=True), 1e-12)
    xn = x_nchw / jnp.maximum(
        jnp.linalg.norm(x_nchw, axis=1, keepdims=True), 1e-12)
    dots = jnp.einsum('bkd,bdhw->bkhw', sn, xn)
    attn = jax.nn.softmax(dots / temp, axis=1) + eps
    attn_w = attn / jnp.sum(attn, axis=(2, 3), keepdims=True)
    slots_out = jnp.einsum('bdhw,bkhw->bkd', x_nchw, attn_w)
    return slots_out, dots


if __name__ == "__main__":
    # Small shapes consistent with the module: B=2, dim_slot D=32,
    # num_slots K=8, spatial 16x16 (N=256).
    B, D, H, W = 2, 32, 16, 16
    K = 8

    key = jax.random.PRNGKey(0)
    kx, ke = jax.random.split(key)
    x = jax.random.normal(kx, (B, D, H, W), dtype=jnp.float32)
    # nn.Embedding default init: N(0, 1)
    slot_embed = jax.random.normal(ke, (K, D), dtype=jnp.float32)

    ref_slots, ref_dots = _reference(x, slot_embed)

    # f32: default tiling, multi-tile accumulation path, and the split-N
    # (dual-TensorCore) path with the cross-split combine.
    for tn, sp in ((None, None), (128, 1), (128, 2)):
        slots_out, dots = semantic_grouping(x, slot_embed, tile_n=tn, n_splits=sp)
        jax.block_until_ready((slots_out, dots))
        assert jnp.allclose(dots, ref_dots, atol=1e-4, rtol=1e-4)
        assert jnp.allclose(slots_out, ref_slots, atol=1e-4, rtol=1e-4)

    # bf16 features (halves the dominant HBM stream); compute stays f32, so
    # compare against the reference evaluated on the same bf16-quantized x.
    x_bf = x.astype(jnp.bfloat16)
    ref_slots_bf, ref_dots_bf = _reference(x_bf.astype(jnp.float32), slot_embed)
    slots_bf, dots_bf = semantic_grouping(x_bf, slot_embed)
    jax.block_until_ready((slots_bf, dots_bf))
    assert jnp.allclose(dots_bf, ref_dots_bf, atol=1e-3, rtol=1e-3)
    assert jnp.allclose(slots_bf, ref_slots_bf, atol=1e-3, rtol=1e-3)

    print("KERNEL_OK")
</pallas_src>

<mosaic_0001>
module attributes {stable_mosaic.version = 11 : i64} {
  func.func @_semantic_grouping_kernel(%arg0: i32, %arg1: i32, %arg2: i32, %arg3: memref<1x32x256xf32, #tpu.memory_space<vmem>>, %arg4: memref<8x32xf32, #tpu.memory_space<vmem>>, %arg5: memref<1x8x256xf32, #tpu.memory_space<vmem>>, %arg6: memref<1x1x32x8xf32, #tpu.memory_space<vmem>>, %arg7: memref<1x1x8x1xf32, #tpu.memory_space<vmem>>) attributes {dimension_semantics = [#tpu.dimension_semantics<parallel>, #tpu.dimension_semantics<parallel>, #tpu.dimension_semantics<arbitrary>], iteration_bounds = array<i64: 2, 1, 1>, scalar_prefetch = 0 : i64, scratch_operands = 0 : i64, tpu.core_type = #tpu.core_type<tc>, window_params = [{transform_indices = @transform_0, window_bounds = array<i64: 1, 32, 256>}, {pipeline_mode = #tpu.pipeline_mode<synchronous>, transform_indices = @transform_1, window_bounds = array<i64: 8, 32>}, {transform_indices = @transform_2, window_bounds = array<i64: 1, 8, 256>}, {transform_indices = @transform_3, window_bounds = array<i64: 1, 1, 32, 8>}, {transform_indices = @transform_4, window_bounds = array<i64: 1, 1, 8, 1>}]} {
    %c0_i32 = arith.constant 0 : i32
    %0 = arith.cmpi eq, %arg2, %c0_i32 : i32
    %1 = arith.extui %0 : i1 to i32
    %c0_i32_0 = arith.constant 0 : i32
    %2 = arith.cmpi ne, %1, %c0_i32_0 : i32
    scf.if %2 {
      %cst_32 = arith.constant 0.000000e+00 : f32
      %46 = vector.broadcast %cst_32 : f32 to vector<32x8xf32>
      %c0_33 = arith.constant 0 : index
      %c0_34 = arith.constant 0 : index
      %c0_35 = arith.constant 0 : index
      %c0_36 = arith.constant 0 : index
      %47 = vector.load %arg6[%c0_33, %c0_34, %c0_35, %c0_36] : memref<1x1x32x8xf32, #tpu.memory_space<vmem>>, vector<1x1x32x8xf32>
      %48 = vector.shape_cast %47 : vector<1x1x32x8xf32> to vector<32x8xf32>
      %49 = vector.shape_cast %46 : vector<32x8xf32> to vector<1x1x32x8xf32>
      tpu.vector_store %arg6[%c0_33, %c0_34, %c0_35, %c0_36], %49 {strides = array<i32>} : memref<1x1x32x8xf32, #tpu.memory_space<vmem>>, vector<1x1x32x8xf32>,
      %cst_37 = arith.constant 0.000000e+00 : f32
      %50 = vector.broadcast %cst_37 : f32 to vector<8x1xf32>
      %c0_38 = arith.constant 0 : index
      %c0_39 = arith.constant 0 : index
      %c0_40 = arith.constant 0 : index
      %c0_41 = arith.constant 0 : index
      %51 = vector.load %arg7[%c0_38, %c0_39, %c0_40, %c0_41] : memref<1x1x8x1xf32, #tpu.memory_space<vmem>>, vector<1x1x8x1xf32>
      %52 = vector.shape_cast %51 : vector<1x1x8x1xf32> to vector<8x1xf32>
      %53 = vector.shape_cast %50 : vector<8x1xf32> to vector<1x1x8x1xf32>
      tpu.vector_store %arg7[%c0_38, %c0_39, %c0_40, %c0_41], %53 {strides = array<i32>} : memref<1x1x8x1xf32, #tpu.memory_space<vmem>>, vector<1x1x8x1xf32>,
    } else {
    }
    %c0 = arith.constant 0 : index
    %c0_1 = arith.constant 0 : index
    %c0_2 = arith.constant 0 : index
    %3 = vector.load %arg3[%c0, %c0_1, %c0_2] : memref<1x32x256xf32, #tpu.memory_space<vmem>>, vector<1x32x256xf32>
    %4 = vector.shape_cast %3 : vector<1x32x256xf32> to vector<32x256xf32>
    %c0_3 = arith.constant 0 : index
    %c0_4 = arith.constant 0 : index
    %5 = vector.load %arg4[%c0_3, %c0_4] : memref<8x32xf32, #tpu.memory_space<vmem>>, vector<8x32xf32>
    %6 = arith.mulf %4, %4 : vector<32x256xf32>
    %cst = arith.constant dense<0.000000e+00> : vector<256xf32>
    %7 = vector.multi_reduction <add>, %6, %cst [0] : vector<32x256xf32> to vector<256xf32>
    %8 = vector.shape_cast %7 : vector<256xf32> to vector<1x256xf32>
    %cst_5 = arith.constant 1.000000e-24 : f32
    %9 = vector.broadcast %cst_5 : f32 to vector<1x256xf32>
    %10 = arith.maximumf %8, %9 : vector<1x256xf32>
    %11 = math.rsqrt %10 : vector<1x256xf32>
    %cst_6 = arith.constant dense<0.000000e+00> : vector<8x256xf32>
    %12 = tpu.matmul %5, %4, %cst_6 {dimension_numbers = #tpu.dot_dimension_numbers<[1], [0], [0], [1], [0, 0, 1, 1], [], []>} : vector<8x32xf32>, vector<32x256xf32>, vector<8x256xf32> -> vector<8x256xf32>
    %13 = vector.broadcast %11 : vector<1x256xf32> to vector<8x256xf32>
    %14 = arith.mulf %12, %13 : vector<8x256xf32>
    %c0_7 = arith.constant 0 : index
    %c0_8 = arith.constant 0 : index
    %c0_9 = arith.constant 0 : index
    %15 = vector.load %arg5[%c0_7, %c0_8, %c0_9] : memref<1x8x256xf32, #tpu.memory_space<vmem>>, vector<1x8x256xf32>
    %16 = vector.shape_cast %15 : vector<1x8x256xf32> to vector<8x256xf32>
    %17 = vector.shape_cast %14 : vector<8x256xf32> to vector<1x8x256xf32>
    tpu.vector_store %arg5[%c0_7, %c0_8, %c0_9], %17 {strides = array<i32>} : memref<1x8x256xf32, #tpu.memory_space<vmem>>, vector<1x8x256xf32>,
    %cst_10 = arith.constant 14.2857141 : f32
    %18 = vector.broadcast %cst_10 : f32 to vector<8x256xf32>
    %19 = arith.mulf %14, %18 : vector<8x256xf32>
    %cst_11 = arith.constant dense<0xFF800000> : vector<256xf32>
    %20 = vector.multi_reduction <maximumf>, %19, %cst_11 [0] : vector<8x256xf32> to vector<256xf32>
    %21 = vector.shape_cast %20 : vector<256xf32> to vector<1x256xf32>
    %22 = vector.broadcast %21 : vector<1x256xf32> to vector<8x256xf32>
    %23 = arith.subf %19, %22 : vector<8x256xf32>
    %24 = math.exp %23 : vector<8x256xf32>
    %cst_12 = arith.constant dense<0.000000e+00> : vector<256xf32>
    %25 = vector.multi_reduction <add>, %24, %cst_12 [0] : vector<8x256xf32> to vector<256xf32>
    %26 = vector.shape_cast %25 : vector<256xf32> to vector<1x256xf32>
    %27 = vector.broadcast %26 : vector<1x256xf32> to vector<8x256xf32>
    %28 = arith.divf %24, %27 : vector<8x256xf32>
    %cst_13 = arith.constant 9.99999997E-7 : f32
    %29 = vector.broadcast %cst_13 : f32 to vector<8x256xf32>
    %30 = arith.addf %28, %29 : vector<8x256xf32>
    %c0_14 = arith.constant 0 : index
    %c0_15 = arith.constant 0 : index
    %c0_16 = arith.constant 0 : index
    %c0_17 = arith.constant 0 : index
    %31 = vector.load %arg6[%c0_14, %c0_15, %c0_16, %c0_17] : memref<1x1x32x8xf32, #tpu.memory_space<vmem>>, vector<1x1x32x8xf32>
    %32 = vector.shape_cast %31 : vector<1x1x32x8xf32> to vector<32x8xf32>
    %cst_18 = arith.constant dense<0.000000e+00> : vector<32x8xf32>
    %33 = tpu.matmul %4, %30, %cst_18 {dimension_numbers = #tpu.dot_dimension_numbers<[1], [1], [0], [0], [0, 0, 1, 0], [], []>} : vector<32x256xf32>, vector<8x256xf32>, vector<32x8xf32> -> vector<32x8xf32>
    %34 = arith.addf %32, %33 : vector<32x8xf32>
    %c0_19 = arith.constant 0 : index
    %c0_20 = arith.constant 0 : index
    %c0_21 = arith.constant 0 : index
    %c0_22 = arith.constant 0 : index
    %35 = vector.load %arg6[%c0_19, %c0_20, %c0_21, %c0_22] : memref<1x1x32x8xf32, #tpu.memory_space<vmem>>, vector<1x1x32x8xf32>
    %36 = vector.shape_cast %35 : vector<1x1x32x8xf32> to vector<32x8xf32>
    %37 = vector.shape_cast %34 : vector<32x8xf32> to vector<1x1x32x8xf32>
    tpu.vector_store %arg6[%c0_19, %c0_20, %c0_21, %c0_22], %37 {strides = array<i32>} : memref<1x1x32x8xf32, #tpu.memory_space<vmem>>, vector<1x1x32x8xf32>,
    %c0_23 = arith.constant 0 : index
    %c0_24 = arith.constant 0 : index
    %c0_25 = arith.constant 0 : index
    %c0_26 = arith.constant 0 : index
    %38 = vector.load %arg7[%c0_23, %c0_24, %c0_25, %c0_26] : memref<1x1x8x1xf32, #tpu.memory_space<vmem>>, vector<1x1x8x1xf32>
    %39 = vector.shape_cast %38 : vector<1x1x8x1xf32> to vector<8x1xf32>
    %cst_27 = arith.constant dense<0.000000e+00> : vector<8xf32>
    %40 = vector.multi_reduction <add>, %30, %cst_27 [1] : vector<8x256xf32> to vector<8xf32>
    %41 = vector.shape_cast %40 : vector<8xf32> to vector<8x1xf32>
    %42 = arith.addf %39, %41 : vector<8x1xf32>
    %c0_28 = arith.constant 0 : index
    %c0_29 = arith.constant 0 : index
    %c0_30 = arith.constant 0 : index
    %c0_31 = arith.constant 0 : index
    %43 = vector.load %arg7[%c0_28, %c0_29, %c0_30, %c0_31] : memref<1x1x8x1xf32, #tpu.memory_space<vmem>>, vector<1x1x8x1xf32>
    %44 = vector.shape_cast %43 : vector<1x1x8x1xf32> to vector<8x1xf32>
    %45 = vector.shape_cast %42 : vector<8x1xf32> to vector<1x1x8x1xf32>
    tpu.vector_store %arg7[%c0_28, %c0_29, %c0_30, %c0_31], %45 {strides = array<i32>} : memref<1x1x8x1xf32, #tpu.memory_space<vmem>>, vector<1x1x8x1xf32>,
    return
  }
  func.func @transform_0(%arg0: i32, %arg1: i32, %arg2: i32) -> (i32, i32, i32) {
    %c1_i32 = arith.constant 1 : i32
    %0 = arith.muli %arg1, %c1_i32 : i32
    %1 = arith.addi %0, %arg2 : i32
    %c0_i32 = arith.constant 0 : i32
    %c0_i32_0 = arith.constant 0 : i32
    return %arg0, %c0_i32, %1 : i32, i32, i32
  }
  func.func @transform_1(%arg0: i32, %arg1: i32, %arg2: i32) -> (i32, i32) {
    %c0_i32 = arith.constant 0 : i32
    %c0_i32_0 = arith.constant 0 : i32
    %c0_i32_1 = arith.constant 0 : i32
    return %c0_i32, %c0_i32_0 : i32, i32
  }
  func.func @transform_2(%arg0: i32, %arg1: i32, %arg2: i32) -> (i32, i32, i32) {
    %c1_i32 = arith.constant 1 : i32
    %0 = arith.muli %arg1, %c1_i32 : i32
    %1 = arith.addi %0, %arg2 : i32
    %c0_i32 = arith.constant 0 : i32
    %c0_i32_0 = arith.constant 0 : i32
    return %arg0, %c0_i32, %1 : i32, i32, i32
  }
  func.func @transform_3(%arg0: i32, %arg1: i32, %arg2: i32) -> (i32, i32, i32, i32) {
    %c0_i32 = arith.constant 0 : i32
    %c0_i32_0 = arith.constant 0 : i32
    %c0_i32_1 = arith.constant 0 : i32
    return %arg0, %arg1, %c0_i32, %c0_i32_0 : i32, i32, i32, i32
  }
  func.func @transform_4(%arg0: i32, %arg1: i32, %arg2: i32) -> (i32, i32, i32, i32) {
    %c0_i32 = arith.constant 0 : i32
    %c0_i32_0 = arith.constant 0 : i32
    %c0_i32_1 = arith.constant 0 : i32
    return %arg0, %arg1, %c0_i32, %c0_i32_0 : i32, i32, i32, i32
  }
}

</mosaic_0001>

<bundles_post_ra>
// kernel: tpu_custom_call.1
= control target key start
LH: loop header
LB: loop body
LE: loop exit
PB: predicated region body
PF: predicated region fallthrough
CT: control target
= control target key end

     0   :  { %s1313_s0 = inlined_call_operand.hbm [shape: f32[2,32,256], index: 0, kind: input, shape index: {}]   ;;  %s1314_s1 = inlined_call_operand.hbm [shape: f32[8,32], index: 1, kind: input, shape index: {}]   ;;  %s1315_s2 = inlined_call_operand.hbm [shape: f32[2,8,256], index: 2, kind: output, shape index: {0}]   ;;  %s1316_s3 = inlined_call_operand.vmem [shape: f32[2,1,32,8], index: 3, kind: output, shape index: {1}]   ;;  %s1317_s4 = inlined_call_operand.vmem [shape: f32[2,1,8,1], index: 4, kind: output, shape index: {2}]  }
   0x1   :  { %1320 = sst [smem:[#allocation12_spill]] %s1314_s1 }
   0x2   :  { %10 = vsyncpa [#allocation3], 0 }
   0x3   :  { %12 = vsyncpa [#allocation3 + $0x1], 0 }
   0x4   :  { %13 = vsyncpa [#allocation6], 0 }
   0x5   :  { %14 = vsyncpa [#allocation4], 0 }
   0x6   :  { %16 = vsyncpa [#allocation4 + $0x1], 0  ;;  %s1071_s15 = smov 0   ;;  %s1073_s16 = smov 0  }
   0x7   :  { %s1075_s17 = smov 0   ;;  %s1077_s18 = smov 0  }
   0x8   :  { %s1079_s19 = smov 0   ;;  %s1081_s20 = smov 0  }
   0x9 LB: > { %1321 = sst [smem:[#allocation11_spill]] %s1040_s20  ;;  %s779_s21 = sadd.s32 4294967295, %s1040_s20   ;;  %s1040_s20 = sphi %s1081_s20, %s22_s20   ;;  %s1036_s19 = sphi %s1079_s19, %s1335_s19   ;;  %s1032_s18 = sphi %s1077_s18, %s1334_s18   ;;  %s1028_s17 = sphi %s1075_s17, %s1333_s17   ;;  %s1024_s16 = sphi %s1073_s16, %s1332_s16   ;;  %s1020_s15 = sphi %s1071_s15, %s1331_s15  }
   0xa   : > { %s780_s22 = sadd.s32 4294967294, %s1040_s20   ;;  %s52_s23 = sadd.s32 1, %s1028_s17 }
   0xb   : > { %p59_p0 = scmp.ne.s32.totalorder %s1028_s17, %s1024_s16  ;;  %p60_p1 = scmp.eq.s32.totalorder %s1040_s20, 0 }
   0xc   : > { %p65_p2 = scmp.ne.s32.totalorder %s1024_s16, %s1020_s15  ;;  %p1109_p3 = scmp.eq.s32.totalorder %s779_s21, 0 }
   0xd   : > { %p114_p4 = scmp.eq.s32.totalorder %s779_s21, 1  ;;  %p1113_p5 = por %p60_p1, %p59_p0 }
   0xe   : > { %p120_p6 = scmp.eq.s32.totalorder %s780_s22, 1  ;;  %p1119_p7 = por %p1109_p3, %p65_p2 }
   0xf   : > { %p1123_p8 = por %p114_p4, %p59_p0  ;;  %p781_p10 = scmp.ge.s32.totalorder %s1040_s20, 1 }
  0x10   : > { %p1127_p9 = por %p120_p6, %p65_p2  ;;  %p183_p11 = scmp.lt.s32.totalorder %s1040_s20, 3 }
  0x11   : > { %s1327_s1 = sld [smem:[#allocation12_spill]]  ;;  %s1042_s7 = smov [#allocation5]  }
  0x12   : > { %p1136_p12 = pnand %p781_p10, %p183_p11  ;;  %s197_s8 = sshll.u32 %s1042_s7, 4  ;;  %s198_s8 = int_to_ptr.vmem [resolvable:$true] %s197_s8 }
  0x13   : > { %p783_p13 = scmp.ge.s32.totalorder %s1040_s20, 2  ;;  %p827_p1 = scmp.lt.s32.totalorder %s1040_s20, 2 }
  0x14   : > { %p814_p0 = pneg %p1136_p12  ;;  %s41_s10 = sadd.s32 1, %s1036_s19 }
  0x15   : > { %p1148_p4 = pnand %p827_p1, %p1113_p5  ;;  %p43_p6 = scmp.ge.s32.totalorder %s41_s10, 2 }
  0x16   : > { %p815_p2 = pnand %p814_p0, %p1109_p3  ;;  %s208_s11 = sand.u32 1, %s1028_s17  }
  0x17   : > { %s195_s5 = sshll.u32 %s1327_s1, 4  ;;  %s1337_s10 = smov (%p43_p6, %s41_s10), 0  ;;  %s196_s5 = int_to_ptr.hbm [resolvable:$true] %s195_s5 }
  0x18   : > { %817 = dma.hbm_to_vmem [thread:$0]  (!%p815_p2), %s196_s5, 128, %s198_s8, [#allocation6]  }
  0x19   : > { %s784_s12 = sshll.u32 %s208_s11, 6  ;;  %s47_s13 = ssub.s32 %s1036_s19, %s1337_s10 }
  0x1a   : > { %p50_p10 = scmp.eq.s32.totalorder %s47_s13, 0  ;;  %s801_s14 = sshll.u32 %s1036_s19, 6 }
  0x1b   : > { %s220_s25 = scalar_lea.hbm %s1313_s0, %s801_s14  ;;  %s212_s29 = scalar_lea.vmem [#allocation2], %s784_s12 }
  0x1c   : > { %s223_s30 = sshll.u32 %s212_s29, 4  ;;  %s221_s1 = sshll.u32 %s220_s25, 4  ;;  %s224_s30 = int_to_ptr.vmem [resolvable:$true] %s223_s30  ;;  %s222_s1 = int_to_ptr.hbm [resolvable:$true] %s221_s1 }
  0x1d   : > { %s1165_s7 = scalar_select %p50_p10, %s1028_s17, %s52_s23  }
  0x1e   : > { %s209_s5 = scalar_lea.sflag [#allocation3], %s208_s11  ;;  %s1043_s8 = smov 256  }
  0x1f   : > { %s1044_s20 = smov 16   ;;  %235 = sbr.rel (%p1136_p12) target bundleno = 390 (0x186), region = 28 }
  0x20   : > { %821 = dma.hbm_to_vmem [thread:$0]  (!%p1148_p4), %s222_s1, 1024, %s224_s30, %s209_s5, %s1043_s8, %s1043_s8, %s1044_s20  }
  0x21   : > { %s1172_s13 = sand.u32 (!%p1136_p12), 1, %s1024_s16  }
  0x22   : > { %s788_s12 = sshll.u32 (!%p1136_p12), %s1172_s13, 6  ;;  %s238_s23 = scalar_lea.sflag (!%p1136_p12), [#allocation3], %s1172_s13 }
  0x23   : > { %s241_s14 = scalar_lea.vmem (!%p1136_p12), [#allocation2], %s788_s12 }
  0x24   : > { %1007 = dma.done.wait (%p1119_p7), %s238_s23, 1024  }
  0x25   : > { %1009 = vsyncadd (%p1119_p7), %s238_s23, 4294966272 }
  0x26   : > { %1011 = dma.done.wait (%p1109_p3), [#allocation6], 128  }
  0x27   : > { %1013 = vsyncadd (%p1109_p3), [#allocation6], 4294967168  ;;  %v1184_v0 = vld [vmem:[%s241_s14 + $0x30] sm:$0xff]  ;;  %v1186_v1 = vld [vmem:[%s241_s14 + $0x38] sm:$0xff]  ;;  %vm376_vm0 = vcmask 261120   ;;  %s790_s1 = sshll.u32 %s1172_s13, 4 }
  0x28   : > { %v1188_v2 = vld [vmem:[%s241_s14 + $0x20] sm:$0xff]  ;;  %392 = vmatpush.msra.mxu0 %v1184_v0  ;;  %412 = vmatpush.msra.mxu1 %v1186_v1  ;;  %v1192_v3 = vld [vmem:[%s241_s14 + $0x28] sm:$0xff]  ;;  %v1194_v4 = vld [vmem:[%s241_s14 + $0x10] sm:$0xff]  ;;  %v334_v17 = vmul.f32 %v1184_v0, %v1184_v0  ;;  %v335_v19 = vmul.f32 %v1186_v1, %v1186_v1  ;;  %s1225_s20 = scalar_lea.vmem [#allocation7], %s790_s1  ;;  %p292_p3 = scmp.lt.s32.totalorder %s1032_s18, 1  ;;  %vm312_vm7 = vcmask 64512  }
  0x29   : > { %v1196_v5 = vld [vmem:[%s241_s14 + $0x18] sm:$0xff]  ;;  %v1200_v6 = vld [vmem:[%s241_s14] sm:$0xff]  ;;  %v1202_v7 = vld [vmem:[%s241_s14 + $0x8] sm:$0xff]  ;;  %v330_v9 = vmul.f32 %v1194_v4, %v1194_v4  ;;  %v332_v13 = vmul.f32 %v1188_v2, %v1188_v2  ;;  %v333_v15 = vmul.f32 %v1192_v3, %v1192_v3  ;;  %vm317_vm9 = vcmask 7168   ;;  %s803_s30 = sshll.u32 %s1032_s18, 4  ;;  %s599_s23 = sshll.u32 %s1225_s20, 4  ;;  %s600_s23 = int_to_ptr.vmem [resolvable:$true] %s599_s23 }
  0x2a   : > { %393 = vmatpush.msra.mxu0 %v1188_v2  ;;  %413 = vmatpush.msra.mxu1 %v1192_v3  ;;  %v327_v8 = vld [vmem:[#allocation5] sm:$0xff]  ;;  %v328_v10 = vmul.f32 %v1200_v6, %v1200_v6  ;;  %v331_v11 = vmul.f32 %v1196_v5, %v1196_v5  ;;  %v329_v12 = vmul.f32 %v1202_v7, %v1202_v7  ;;  %s293_s24 = scalar_select %p292_p3, %s1032_s18, 1 }
  0x2b   : > { %s597_s12 = scalar_lea.hbm %s1315_s2, %s803_s30  ;;  %s567_s1 = scalar_lea.sflag [#allocation4], %s1172_s13 }
  0x2c   : > { %394 = vmatpush.msra.mxu0 %v1194_v4  ;;  %414 = vmatpush.msra.mxu1 %v1196_v5  ;;  %v336_v14 = vadd.f32 %v330_v9, %v328_v10  ;;  %v345_v16 = vadd.f32 %v331_v11, %v329_v12  ;;  %s802_s26 = sshll.u32 %s293_s24, 5  ;;  %s793_s21 = sshll.u32 %s293_s24, 3 }
  0x2d   : > { %s1234_s11 = scalar_lea.vmem %s1316_s3, %s802_s26  ;;  %s1241_s29 = scalar_lea.vmem %s1317_s4, %s793_s21 }
  0x2e   : > { %395 = vmatpush.msra.mxu0 %v1200_v6  ;;  %415 = vmatpush.msra.mxu1 %v1202_v7  ;;  %v337_v18 = vadd.f32 %v336_v14, %v332_v13  ;;  %v346_v20 = vadd.f32 %v345_v16, %v333_v15  ;;  %s601_s14 = sshll.u32 %s597_s12, 4  ;;  %s974_s18 = scalar_lea.hbm %s1315_s2, 32  ;;  %s602_s14 = int_to_ptr.hbm [resolvable:$true] %s601_s14 }
  0x2f   : > { %794 = vmatmul.msk.f32.vlgmr.msra.gmra.mxu0 %vm376_vm0, %v327_v8  ;;  %795 = vmatmul.msk.f32.vlgmr.msra.gmra.mxu1 %vm376_vm0, %v327_v8  ;;  %s968_s24 = sshra.s32 %s602_s14, 4  ;;  %s969_s24 = int_to_ptr.hbm [resolvable:$true] %s968_s24 }
  0x30   : > { %v338_v21 = vadd.f32 %v337_v18, %v334_v17  ;;  %v347_v22 = vadd.f32 %v346_v20, %v335_v19  ;;  %s970_s26 = scalar_lea.hbm %s969_s24, 16  ;;  %p975_p12 = scmp.lt.s32.totalorder %s969_s24, %s1315_s2 }
  0x31   : > { %p971_p5 = scmp.ne.s32.totalorder %s969_s24, %s970_s26  ;;  %p976_p0 = scmp.lt.s32.totalorder %s974_s18, %s970_s26 }
  0x32   : > { %v339_v23 = vrot.slane %v338_v21, 4  ;;  %v348_v24 = vrot.slane %v347_v22, 4 }
  0x33   : > { %p972_p7 = pnand %p971_p5, %p1123_p8  ;;  %p977_p1 = por %p976_p0, %p975_p12 }
  0x34   : > { %v340_v25 = vadd.f32 %v339_v23, %v338_v21  ;;  %v349_v26 = vadd.f32 %v348_v24, %v347_v22 }
  0x35   : > { %p973_p11 = pneg %p972_p7 }
  0x36   : > { %v341_v27 = vrot.slane %v340_v25, 2  ;;  %v350_v28 = vrot.slane %v349_v26, 2 }
  0x37   : > { %p978_p2 = pnand %p977_p1, %p973_p11 }
  0x38   : > { %v342_v29 = vadd.f32 %v341_v27, %v340_v25  ;;  %v351_v30 = vadd.f32 %v350_v28, %v349_v26 }
  0x3a   : > { %v343_v31 = vrot.slane %v342_v29, 1  ;;  %v352_v32 = vrot.slane %v351_v30, 1 }
  0x3c   : > { %v344_v33 = vadd.f32 %v343_v31, %v342_v29  ;;  %v353_v34 = vadd.f32 %v352_v32, %v351_v30 }
  0x3e   : > { %v354_v35 = vmax.f32 %v344_v33, 1e-24  ;;  %v355_v36 = vmax.f32 %v353_v34, 1e-24 }
  0x40   : > { %882 = vrsqrt.f32 %v354_v35  ;;  %vm362_vm1 = vweird.f32 %v354_v35  ;;  %vm372_vm3 = vweird.f32 %v355_v36 }
  0x41   : > { %884 = vrsqrt.f32 %v355_v36 }
  0x46   : > { %v883_v37 = vpop.eup %882 }
  0x47   : > { %v885_v38 = vpop.eup %884  ;;  %v357_v39 = vmul.f32 %v883_v37, %v354_v35  ;;  %vm363_vm2 = vweird.f32 %v883_v37 }
  0x48   : > { %v367_v40 = vmul.f32 %v885_v38, %v355_v36  ;;  %vm373_vm4 = vweird.f32 %v885_v38  ;;  %vm364_vm5 = vmor %vm362_vm1, %vm363_vm2 }
  0x49   : > { %v358_v41 = vmul.f32 %v883_v37, %v357_v39  ;;  %vm374_vm6 = vmor %vm372_vm3, %vm373_vm4  ;;  %v1045_v39 = vmov 0.0  }
  0x4a   : > { %v368_v42 = vmul.f32 %v885_v38, %v367_v40  ;;  %313 = vst.msk [vmem:[%s1234_s11] sm:$0xff] %vm312_vm7, %v1045_v39 }
  0x4b   : > { %v359_v43 = vmul.f32 0.5, %v358_v41  ;;  %314 = vst.msk [vmem:[%s1234_s11 + $0x8] sm:$0xff] %vm312_vm7, %v1045_v39 }
  0x4c   : > { %v369_v44 = vmul.f32 0.5, %v368_v42  ;;  %315 = vst.msk [vmem:[%s1234_s11 + $0x10] sm:$0xff] %vm312_vm7, %v1045_v39 }
  0x4d   : > { %v360_v45 = vsub.f32 1.5, %v359_v43  ;;  %316 = vst.msk [vmem:[%s1234_s11 + $0x18] sm:$0xff] %vm312_vm7, %v1045_v39 }
  0x4e   : > { %v370_v46 = vsub.f32 1.5, %v369_v44  ;;  %318 = vst.msk [vmem:[%s1241_s29] sm:$0xff] %vm317_vm9, %v1045_v39 }
  0x4f   : > { %v361_v47 = vmul.f32 %v883_v37, %v360_v45 }
  0x50   : > { %v371_v48 = vmul.f32 %v885_v38, %v370_v46 }
  0x51   : > { %v365_v49 = vsel %vm364_vm5, %v883_v37, %v361_v47 }
  0x52   : > { %v375_v50 = vsel %vm374_vm6, %v885_v38, %v371_v48 }
  0xac   : > { %v397_v51 = vpop.f32.mrf.mxu0  ;;  %v417_v52 = vpop.f32.mrf.mxu1 }
  0xad   : > { %v420_v53 = vmul.f32 %v397_v51, %v365_v49  ;;  %v421_v54 = vmul.f32 %v417_v52, %v375_v50 }
  0xaf   : > { %422 = vst [vmem:[%s1225_s20] sm:$0xff] %v420_v53  ;;  %v424_v55 = vmul.f32 14.285714, %v420_v53  ;;  %v425_v56 = vmul.f32 14.285714, %v421_v54 }
  0xb0   : > { %423 = vst [vmem:[%s1225_s20 + $0x8] sm:$0xff] %v421_v54 }
  0xb1   : > { %v426_v57 = vrot.slane %v424_v55, 4  ;;  %v432_v58 = vrot.slane %v425_v56, 4 }
  0xb3   : > { %v427_v59 = vmax.f32 %v424_v55, %v426_v57  ;;  %v433_v60 = vmax.f32 %v425_v56, %v432_v58 }
  0xb5   : > { %v428_v61 = vrot.slane %v427_v59, 2  ;;  %v434_v62 = vrot.slane %v433_v60, 2 }
  0xb7   : > { %v429_v63 = vmax.f32 %v427_v59, %v428_v61  ;;  %v435_v8 = vmax.f32 %v433_v60, %v434_v62 }
  0xb9   : > { %v430_v9 = vrot.slane %v429_v63, 1  ;;  %v436_v10 = vrot.slane %v435_v8, 1 }
  0xbb   : > { %v431_v11 = vmax.f32 %v429_v63, %v430_v9  ;;  %v437_v12 = vmax.f32 %v435_v8, %v436_v10 }
  0xbd   : > { %v438_v13 = vsub.f32 %v424_v55, %v431_v11  ;;  %v439_v14 = vsub.f32 %v425_v56, %v437_v12 }
  0xbf   : > { %v440_v15 = vmul.f32 1.442695, %v438_v13  ;;  %v442_v16 = vmul.f32 1.442695, %v439_v14 }
  0xc1   : > { %886 = vpow2.f32 %v440_v15 }
  0xc2   : > { %888 = vpow2.f32 %v442_v16 }
  0xc7   : > { %v887_v17 = vpop.eup %886 }
  0xc8   : > { %v889_v18 = vpop.eup %888  ;;  %v444_v19 = vrot.slane %v887_v17, 4 }
  0xc9   : > { %v450_v20 = vrot.slane %v889_v18, 4 }
  0xca   : > { %v445_v21 = vadd.f32 %v887_v17, %v444_v19 }
  0xcb   : > { %v451_v22 = vadd.f32 %v889_v18, %v450_v20 }
  0xcc   : > { %v446_v23 = vrot.slane %v445_v21, 2 }
  0xcd   : > { %v452_v24 = vrot.slane %v451_v22, 2 }
  0xce   : > { %v447_v25 = vadd.f32 %v446_v23, %v445_v21 }
  0xcf   : > { %v453_v26 = vadd.f32 %v452_v24, %v451_v22 }
  0xd0   : > { %v448_v27 = vrot.slane %v447_v25, 1 }
  0xd1   : > { %v454_v28 = vrot.slane %v453_v26, 1 }
  0xd2   : > { %v449_v29 = vadd.f32 %v448_v27, %v447_v25 }
  0xd3   : > { %v455_v30 = vadd.f32 %v454_v28, %v453_v26 }
  0xd4   : > { %890 = vrcp.f32 %v449_v29  ;;  %v465_v36 = vand.u32 2147483647, %v449_v29  ;;  %v467_v37 = vand.u32 2147483648, %v449_v29  ;;  %vm461_vm11 = vweird.f32 %v449_v29 }
  0xd5   : > { %892 = vrcp.f32 %v455_v30  ;;  %v482_v41 = vand.u32 2147483648, %v455_v30  ;;  %v480_v43 = vand.u32 2147483647, %v455_v30  ;;  %vm476_vm13 = vweird.f32 %v455_v30 }
  0xd6   : > { %v468_v45 = vor.u32 1.1754944e-38, %v467_v37  ;;  %vm466_vm14 = vcmp.eq.f32.partialorder %v465_v36, 8.507059e+37 }
  0xd7   : > { %v483_v48 = vor.u32 1.1754944e-38, %v482_v41  ;;  %vm481_vm0 = vcmp.eq.f32.partialorder %v480_v43, 8.507059e+37 }
  0xda   : > { %v891_v31 = vpop.eup %890 }
  0xdb   : > { %v893_v32 = vpop.eup %892  ;;  %v457_v33 = vmul.f32 %v891_v31, %v449_v29  ;;  %vm462_vm8 = vweird.f32 %v891_v31 }
  0xdc   : > { %v472_v34 = vmul.f32 %v893_v32, %v455_v30  ;;  %vm477_vm10 = vweird.f32 %v893_v32  ;;  %vm463_vm12 = vmor %vm461_vm11, %vm462_vm8 }
  0xdd   : > { %v458_v35 = vsub.f32 1.0, %v457_v33  ;;  %vm478_vm15 = vmor %vm476_vm13, %vm477_vm10 }
  0xde   : > { %v473_v38 = vsub.f32 1.0, %v472_v34 }
  0xdf   : > { %v459_v40 = vmul.f32 %v891_v31, %v458_v35 }
  0xe0   : > { %v474_v42 = vmul.f32 %v893_v32, %v473_v38 }
  0xe1   : > { %v460_v44 = vadd.f32 %v891_v31, %v459_v40 }
  0xe2   : > { %v475_v46 = vadd.f32 %v893_v32, %v474_v42 }
  0xe3   : > { %v464_v47 = vsel %vm463_vm12, %v891_v31, %v460_v44 }
  0xe4   : > { %v469_v49 = vsel %vm466_vm14, %v468_v45, %v464_v47  ;;  %v479_v50 = vsel %vm478_vm15, %v893_v32, %v475_v46 }
  0xe5   : > { %v470_v51 = vmul.f32 %v887_v17, %v469_v49  ;;  %v484_v52 = vsel %vm481_vm0, %v483_v48, %v479_v50 }
  0xe6   : > { %v485_v53 = vmul.f32 %v889_v18, %v484_v52 }
  0xe7   : > { %v486_v54 = vadd.f32 1e-06, %v470_v51 }
  0xe8   : > { %v487_v55 = vadd.f32 1e-06, %v485_v53 }
  0xe9   : > { %507 = vmatpush.xpose.msrb.mxu0 %v486_v54  ;;  %804 = vmatpush.xpose.msra.mxu2 %v486_v54 }
  0xea   : > { %536 = vmatpush.xpose.msrb.mxu1 %v487_v55  ;;  %805 = vmatpush.xpose.msra.mxu3 %v487_v55  ;;  %v560_v56 = vadd.f32 %v487_v55, %v486_v54 }
  0xec   : > { %561 = vadd.xlane.f32.xlu0 %v560_v56  ;;  %511 = vmatmul.f32.vlgmr.msra.gmra.mxu2 %v1194_v4 }
  0xed   : > { %540 = vmatmul.f32.vlgmr.msra.gmra.mxu3 %v1196_v5  ;;  %508 = vmatmul.f32.vlgmr.msrb.gmra.mxu0 %v1200_v6 }
  0xee   : > { %537 = vmatmul.f32.vlgmr.msrb.gmra.mxu1 %v1202_v7 }
  0xf4   : > { %514 = vmatmul.f32.gmra.mxu2 %v1188_v2 }
  0xf5   : > { %543 = vmatmul.f32.gmra.mxu3 %v1192_v3 }
  0xfc   : > { %517 = vmatmul.f32.gmra.mxu2 %v1184_v0 }
  0xfd   : > { %546 = vmatmul.f32.gmra.mxu3 %v1186_v1 }
  0xfe   : > { %981 = shalt.err (!%p978_p2)
}
  0xff   : > { %812 = dma.vmem_to_hbm [thread:$0]  (%p1123_p8), %s600_s23, 256, %s602_s14, %s567_s1   ;;  %v559_v0 = vld [vmem:[%s1241_s29] sm:$0xff]  ;;  %v489_v58 = vld [vmem:[%s1234_s11 + $0x8] sm:$0xff]  ;;  %v490_v63 = vld [vmem:[%s1234_s11 + $0x10] sm:$0xff] }
 0x100   : > { %v488_v4 = vld [vmem:[%s1234_s11] sm:$0xff]  ;;  %v491_v12 = vld [vmem:[%s1234_s11 + $0x18] sm:$0xff] }
 0x15f   : > { %v562_v1 = vpop.xlane.xlu0 %561 }
 0x160   : > { %v563_v2 = vadd.f32 %v562_v1, %v559_v0 }
 0x162   : > { %565 = vst.msk [vmem:[%s1241_s29] sm:$0xff] %vm317_vm9, %v563_v2 }
 0x16a   : > { %v509_v3 = vpop.f32.mrf.mxu0 }
 0x16b   : > { %v538_v5 = vpop.f32.mrf.mxu1 }
 0x16c   : > { %v539_v6 = vadd.f32 %v538_v5, %v509_v3 }
 0x16e   : > { %v550_v7 = vadd.f32 %v539_v6, %v488_v4 }
 0x16f   : > { %v512_v57 = vpop.f32.mrf.mxu2 }
 0x170   : > { %v541_v59 = vpop.f32.mrf.mxu3  ;;  %555 = vst.msk [vmem:[%s1234_s11] sm:$0xff] %vm312_vm7, %v550_v7 }
 0x171   : > { %v542_v60 = vadd.f32 %v541_v59, %v512_v57 }
 0x173   : > { %v551_v61 = vadd.f32 %v542_v60, %v489_v58 }
 0x175   : > { %556 = vst.msk [vmem:[%s1234_s11 + $0x8] sm:$0xff] %vm312_vm7, %v551_v61 }
 0x177   : > { %v515_v62 = vpop.f32.mrf.mxu2 }
 0x178   : > { %v544_v8 = vpop.f32.mrf.mxu3 }
 0x179   : > { %v545_v9 = vadd.f32 %v544_v8, %v515_v62 }
 0x17b   : > { %v552_v10 = vadd.f32 %v545_v9, %v490_v63 }
 0x17d   : > { %557 = vst.msk [vmem:[%s1234_s11 + $0x10] sm:$0xff] %vm312_vm7, %v552_v10 }
 0x17f   : > { %v518_v11 = vpop.f32.mrf.mxu2 }
 0x180   : > { %v547_v13 = vpop.f32.mrf.mxu3 }
 0x181   : > { %v548_v14 = vadd.f32 %v547_v13, %v518_v11 }
 0x183   : > { %v553_v15 = vadd.f32 %v548_v14, %v491_v12 }
 0x185   : > { %558 = vst.msk [vmem:[%s1234_s11 + $0x18] sm:$0xff] %vm312_vm7, %v553_v15 }
 0x186 PF: > { %s1330_s27 = sld [smem:[#allocation11_spill]]  ;;  %s619_s13 = sand.u32 1, %s1020_s15  }
 0x187   : > { %p823_p8 = pnand %p783_p13, %p1127_p9  ;;  %s620_s20 = scalar_lea.sflag [#allocation4], %s619_s13 }
 0x189   : > { %p824_p4 = pneg %p823_p8 }
 0x18b   : > { %1015 = dma.done.wait (%p824_p4), %s620_s20, 256  }
 0x18c   : > { %1017 = vsyncadd (%p824_p4), %s620_s20, 4294967040  ;;  %s22_s20 = sadd.s32 1, %s1330_s27   ;;  %s1331_s15 = smov %s1024_s16 }
 0x18d   : > { %p19_p6 = scmp.ge.s32.totalorder %s22_s20, 4   ;;  %s1332_s16 = smov %s1028_s17 }
 0x18e   : > { %s1333_s17 = smov %s1165_s7  ;;  %s1334_s18 = smov %s1036_s19 }
 0x18f   : > { %s1335_s19 = smov %s1337_s10  ;;  %21 = sbr.rel (!%p19_p6) target bundleno = 9 (0x9), region = 105 }
 0x194   :  { %648 = vsyncpa [#allocation3], 1 }
 0x195   :  { %650 = vsyncpa [#allocation3 + $0x1], 1 }
 0x196   :  { %651 = vsyncpa [#allocation6], 1 }
 0x197   :  { %652 = vsyncpa [#allocation4], 1 }
 0x198   :  { %654 = vsyncpa [#allocation4 + $0x1], 1 }

</bundles_post_ra>
